<compile_context>
chip_gen: v7x
topology: tpu7x:2x2x1
jax: 0.10.0
libtpu: 0.0.40
codegen_flags: <defaults>
</compile_context>

<pallas_src>
import functools

import jax
import jax.numpy as jnp
from jax.experimental import pallas as pl
from jax.experimental.pallas import tpu as pltpu


def _elem_loss(diff, kind):
    if kind == 'l1':
        return jnp.abs(diff)
    elif kind == 'l2':
        return diff * diff
    elif kind == 'l1_smooth':
        ad = jnp.abs(diff)
        return jnp.where(ad < 1.0, 0.5 * diff * diff, ad - 0.5)
    raise ValueError(f"unknown recons_loss: {kind}")


def _marker_reproj_kernel(pred_ref, targ_ref, mask_ref, num_ref, den_ref, *,
                          loss_kind, total_rows, block_rows, tiles_per_split,
                          needs_guard):
    # Grid: (B, S, tiles_per_split).  Output block index depends only on (b, s),
    # so the (1, 1, 128) f32 outputs stay resident across the inner "arbitrary"
    # tile axis and act as lane-partial accumulators.
    s = pl.program_id(1)
    t = pl.program_id(2)

    @pl.when(t == 0)
    def _init():
        num_ref[...] = jnp.zeros_like(num_ref)
        den_ref[...] = jnp.zeros_like(den_ref)

    # Native-dtype DMA; cast to f32 on the VPU (hidden under the DMA).
    p = pred_ref[...].astype(jnp.float32)      # (1, block_rows, 128)
    q = targ_ref[...].astype(jnp.float32)      # (1, block_rows, 128)
    m = mask_ref[...].astype(jnp.float32)      # (1, block_rows, 128)

    elt = _elem_loss(p - q, loss_kind)
    contrib = elt * m
    den = m

    if needs_guard:
        # Ragged last tile (and any clamped, fully-out-of-range tile from the
        # parallel split): zero out rows beyond the true row count so stale
        # out-of-bounds data (possibly NaN/Inf) never reaches the accumulators.
        tile_id = s * tiles_per_split + t
        row0 = tile_id * block_rows
        rows = jax.lax.broadcasted_iota(jnp.int32, pred_ref.shape, 1) + row0
        valid = rows < total_rows
        contrib = jnp.where(valid, contrib, 0.0)
        den = jnp.where(valid, den, 0.0)

    # Sublane-only reduce; keep the 128-lane axis live (full-width vst).
    num_ref[...] = num_ref[...] + jnp.sum(contrib, axis=1, keepdims=True)
    den_ref[...] = den_ref[...] + jnp.sum(den, axis=1, keepdims=True)


def marker_reproject_loss(marker_pred, marker_proj, mask, timestep_mask,
                          recons_loss='l2', weight=1.0,
                          block_rows=2048, parallel_splits=None,
                          mask_dtype=jnp.bfloat16):
    B, T, N, D = marker_pred.shape
    L = T * N * D

    # Row geometry: R true 128-lane rows per batch; pad rows only up to one
    # full (8, 128) tile for tiny inputs.
    R = pl.cdiv(L, 128)
    R_arr = max(R, 8)
    L_arr = R_arr * 128

    # Contiguous flatten (free reshape, no transpose).
    pred = marker_pred.reshape(B, L)
    targ = marker_proj.reshape(B, L)
    # Mask broadcast over D in a narrow dtype (exact for 0/1 masks) so it shares
    # the pred/targ lane layout.
    mexp = jnp.broadcast_to(mask.reshape(B, T * N, 1), (B, T * N, D))
    mexp = mexp.reshape(B, L).astype(mask_dtype)

    if L_arr != L:
        # Minimal pad to whole 128-lane rows (only hit when T*N*D % 128 != 0;
        # padded mask is zero, padded pred/targ are finite => contribute 0).
        pad = L_arr - L
        pred = jnp.pad(pred, ((0, 0), (0, pad)))
        targ = jnp.pad(targ, ((0, 0), (0, pad)))
        mexp = jnp.pad(mexp, ((0, 0), (0, pad)))

    pred = pred.reshape(B, R_arr, 128)
    targ = targ.reshape(B, R_arr, 128)
    mexp = mexp.reshape(B, R_arr, 128)

    # Tile rows: multiple of 8, never larger than the array's row extent.
    rb = max(8, (min(int(block_rows), R_arr) // 8) * 8)
    n_tiles = pl.cdiv(R_arr, rb)

    # Optional parallel split of the tile axis (keeps both v7x TCs busy at B=1).
    if parallel_splits is None:
        parallel_splits = 2 if B < 2 else 1
    S = max(1, min(int(parallel_splits), n_tiles))
    tiles_per_split = pl.cdiv(n_tiles, S)

    needs_guard = (n_tiles * rb != R_arr) or (S * tiles_per_split != n_tiles)

    def in_map(b, s, t):
        # Clamp so the DMA window always lies within the array; the in-kernel
        # row guard discards anything the clamp duplicated.
        return (b, jnp.minimum(s * tiles_per_split + t, n_tiles - 1), 0)

    def out_map(b, s, t):
        return (b * S + s, 0, 0)

    kernel = functools.partial(
        _marker_reproj_kernel,
        loss_kind=recons_loss, total_rows=R_arr, block_rows=rb,
        tiles_per_split=tiles_per_split, needs_guard=needs_guard)

    bytes_accessed = (pred.size * pred.dtype.itemsize
                      + targ.size * targ.dtype.itemsize
                      + mexp.size * mexp.dtype.itemsize
                      + 2 * B * S * 128 * 4)
    cost = pl.CostEstimate(flops=6 * B * L, transcendentals=0,
                           bytes_accessed=bytes_accessed)

    num_part, den_part = pl.pallas_call(
        kernel,
        out_shape=(jax.ShapeDtypeStruct((B * S, 1, 128), jnp.float32),
                   jax.ShapeDtypeStruct((B * S, 1, 128), jnp.float32)),
        grid_spec=pltpu.PrefetchScalarGridSpec(
            num_scalar_prefetch=0,
            grid=(B, S, tiles_per_split),
            in_specs=[
                pl.BlockSpec((1, rb, 128), in_map),
                pl.BlockSpec((1, rb, 128), in_map),
                pl.BlockSpec((1, rb, 128), in_map),
            ],
            out_specs=[
                pl.BlockSpec((1, 1, 128), out_map),
                pl.BlockSpec((1, 1, 128), out_map),
            ],
        ),
        compiler_params=pltpu.CompilerParams(
            dimension_semantics=("parallel", "parallel", "arbitrary")),
        cost_estimate=cost,
    )(pred, targ, mexp)

    # Tiny epilogue in plain JAX: 128-lane + split reduce, per-batch normalize,
    # then the timestep-mask reduction over B.
    num_b = num_part.reshape(B, -1).sum(axis=1)          # sum(elt * mask_expanded)
    den_b = den_part.reshape(B, -1).sum(axis=1)          # D * sum(mask)
    loss_b = (num_b / D) / (den_b / D + 1e-7)            # matches mean(dim=-1) semantics
    tm = timestep_mask.astype(jnp.float32)
    out = jnp.sum(loss_b * tm) / (jnp.sum(tm) + 1e-7)
    return out * weight


def _reference(marker_pred, marker_proj, mask, timestep_mask,
               recons_loss='l2', weight=1.0):
    diff = marker_pred.astype(jnp.float32) - marker_proj.astype(jnp.float32)
    elt = _elem_loss(diff, recons_loss)
    per = jnp.mean(elt, axis=-1, keepdims=True)
    m = mask.astype(jnp.float32)
    lb = jnp.sum(per * m, axis=(-1, -2, -3)) / (jnp.sum(m, axis=(-1, -2, -3)) + 1e-7)
    tm = timestep_mask.astype(jnp.float32)
    return (jnp.sum(lb * tm, axis=0) / (jnp.sum(tm, axis=0) + 1e-7)) * weight


if __name__ == "__main__":
    key = jax.random.PRNGKey(0)

    # Case 1: B=2 (B-axis parallel, single split).
    B, T, N, D = 2, 8, 16, 3
    k1, k2, k3, k4, k5 = jax.random.split(key, 5)
    marker_pred = jax.random.normal(k1, (B, T, N, D), dtype=jnp.float32)
    marker_proj = jax.random.normal(k2, (B, T, N, D), dtype=jnp.float32)
    mask = (jax.random.uniform(k3, (B, T, N, 1)) > 0.3).astype(jnp.float32)
    timestep_mask = (jax.random.uniform(k4, (B,)) > 0.2).astype(jnp.float32)

    for kind in ('l2', 'l1', 'l1_smooth'):
        out = marker_reproject_loss(marker_pred, marker_proj, mask,
                                    timestep_mask, recons_loss=kind, weight=1.0)
        out = jax.block_until_ready(out)
        ref = _reference(marker_pred, marker_proj, mask, timestep_mask,
                         recons_loss=kind, weight=1.0)
        assert jnp.allclose(out, ref, rtol=2e-5, atol=1e-5), (kind, out, ref)

    # Case 2: B=1 with a forced tile-axis parallel split + ragged last tile
    # (exercises the S>1 path and the in-kernel row-validity guard).
    B2, T2, N2, D2 = 1, 24, 16, 3
    k6, k7, k8, k9 = jax.random.split(k5, 4)
    mp2 = jax.random.normal(k6, (B2, T2, N2, D2), dtype=jnp.float32)
    mq2 = jax.random.normal(k7, (B2, T2, N2, D2), dtype=jnp.float32)
    mk2 = (jax.random.uniform(k8, (B2, T2, N2, 1)) > 0.3).astype(jnp.float32)
    tm2 = jnp.ones((B2,), dtype=jnp.float32)

    out2 = marker_reproject_loss(mp2, mq2, mk2, tm2, recons_loss='l2',
                                 weight=1.0, block_rows=8, parallel_splits=2)
    out2 = jax.block_until_ready(out2)
    ref2 = _reference(mp2, mq2, mk2, tm2, recons_loss='l2', weight=1.0)
    assert jnp.allclose(out2, ref2, rtol=2e-5, atol=1e-5), (out2, ref2)

    print("KERNEL_OK")
</pallas_src>

<mosaic_0001>
module attributes {stable_mosaic.version = 11 : i64} {
  func.func @_marker_reproj_kernel(%arg0: i32, %arg1: i32, %arg2: i32, %arg3: memref<1x8x128xf32, #tpu.memory_space<vmem>>, %arg4: memref<1x8x128xf32, #tpu.memory_space<vmem>>, %arg5: memref<1x8x128xbf16, #tpu.memory_space<vmem>>, %arg6: memref<1x1x128xf32, #tpu.memory_space<vmem>>, %arg7: memref<1x1x128xf32, #tpu.memory_space<vmem>>) attributes {dimension_semantics = [#tpu.dimension_semantics<parallel>, #tpu.dimension_semantics<parallel>, #tpu.dimension_semantics<arbitrary>], iteration_bounds = array<i64: 2, 1, 1>, scalar_prefetch = 0 : i64, scratch_operands = 0 : i64, tpu.core_type = #tpu.core_type<tc>, window_params = [{transform_indices = @transform_0, window_bounds = array<i64: 1, 8, 128>}, {transform_indices = @transform_1, window_bounds = array<i64: 1, 8, 128>}, {transform_indices = @transform_2, window_bounds = array<i64: 1, 8, 128>}, {transform_indices = @transform_3, window_bounds = array<i64: 1, 1, 128>}, {transform_indices = @transform_4, window_bounds = array<i64: 1, 1, 128>}]} {
    %c0_i32 = arith.constant 0 : i32
    %0 = arith.cmpi eq, %arg2, %c0_i32 : i32
    %1 = arith.extui %0 : i1 to i32
    %c0_i32_0 = arith.constant 0 : i32
    %2 = arith.cmpi ne, %1, %c0_i32_0 : i32
    scf.if %2 {
      %cst_22 = arith.constant 0.000000e+00 : f32
      %20 = vector.broadcast %cst_22 : f32 to vector<1x1x128xf32>
      %c0_23 = arith.constant 0 : index
      %c0_24 = arith.constant 0 : index
      %c0_25 = arith.constant 0 : index
      %21 = vector.load %arg6[%c0_23, %c0_24, %c0_25] : memref<1x1x128xf32, #tpu.memory_space<vmem>>, vector<1x1x128xf32>
      tpu.vector_store %arg6[%c0_23, %c0_24, %c0_25], %20 {strides = array<i32>} : memref<1x1x128xf32, #tpu.memory_space<vmem>>, vector<1x1x128xf32>,
      %cst_26 = arith.constant 0.000000e+00 : f32
      %22 = vector.broadcast %cst_26 : f32 to vector<1x1x128xf32>
      %c0_27 = arith.constant 0 : index
      %c0_28 = arith.constant 0 : index
      %c0_29 = arith.constant 0 : index
      %23 = vector.load %arg7[%c0_27, %c0_28, %c0_29] : memref<1x1x128xf32, #tpu.memory_space<vmem>>, vector<1x1x128xf32>
      tpu.vector_store %arg7[%c0_27, %c0_28, %c0_29], %22 {strides = array<i32>} : memref<1x1x128xf32, #tpu.memory_space<vmem>>, vector<1x1x128xf32>,
    } else {
    }
    %c0 = arith.constant 0 : index
    %c0_1 = arith.constant 0 : index
    %c0_2 = arith.constant 0 : index
    %3 = vector.load %arg3[%c0, %c0_1, %c0_2] : memref<1x8x128xf32, #tpu.memory_space<vmem>>, vector<1x8x128xf32>
    %c0_3 = arith.constant 0 : index
    %c0_4 = arith.constant 0 : index
    %c0_5 = arith.constant 0 : index
    %4 = vector.load %arg4[%c0_3, %c0_4, %c0_5] : memref<1x8x128xf32, #tpu.memory_space<vmem>>, vector<1x8x128xf32>
    %c0_6 = arith.constant 0 : index
    %c0_7 = arith.constant 0 : index
    %c0_8 = arith.constant 0 : index
    %5 = vector.load %arg5[%c0_6, %c0_7, %c0_8] : memref<1x8x128xbf16, #tpu.memory_space<vmem>>, vector<1x8x128xbf16>
    %6 = arith.extf %5 : vector<1x8x128xbf16> to vector<1x8x128xf32>
    %7 = arith.subf %3, %4 : vector<1x8x128xf32>
    %8 = arith.mulf %7, %7 : vector<1x8x128xf32>
    %9 = arith.mulf %8, %6 : vector<1x8x128xf32>
    %c0_9 = arith.constant 0 : index
    %c0_10 = arith.constant 0 : index
    %c0_11 = arith.constant 0 : index
    %10 = vector.load %arg6[%c0_9, %c0_10, %c0_11] : memref<1x1x128xf32, #tpu.memory_space<vmem>>, vector<1x1x128xf32>
    %cst = arith.constant dense<0.000000e+00> : vector<1x128xf32>
    %11 = vector.multi_reduction <add>, %9, %cst [1] : vector<1x8x128xf32> to vector<1x128xf32>
    %12 = vector.shape_cast %11 : vector<1x128xf32> to vector<1x1x128xf32>
    %13 = arith.addf %10, %12 : vector<1x1x128xf32>
    %c0_12 = arith.constant 0 : index
    %c0_13 = arith.constant 0 : index
    %c0_14 = arith.constant 0 : index
    %14 = vector.load %arg6[%c0_12, %c0_13, %c0_14] : memref<1x1x128xf32, #tpu.memory_space<vmem>>, vector<1x1x128xf32>
    tpu.vector_store %arg6[%c0_12, %c0_13, %c0_14], %13 {strides = array<i32>} : memref<1x1x128xf32, #tpu.memory_space<vmem>>, vector<1x1x128xf32>,
    %c0_15 = arith.constant 0 : index
    %c0_16 = arith.constant 0 : index
    %c0_17 = arith.constant 0 : index
    %15 = vector.load %arg7[%c0_15, %c0_16, %c0_17] : memref<1x1x128xf32, #tpu.memory_space<vmem>>, vector<1x1x128xf32>
    %cst_18 = arith.constant dense<0.000000e+00> : vector<1x128xf32>
    %16 = vector.multi_reduction <add>, %6, %cst_18 [1] : vector<1x8x128xf32> to vector<1x128xf32>
    %17 = vector.shape_cast %16 : vector<1x128xf32> to vector<1x1x128xf32>
    %18 = arith.addf %15, %17 : vector<1x1x128xf32>
    %c0_19 = arith.constant 0 : index
    %c0_20 = arith.constant 0 : index
    %c0_21 = arith.constant 0 : index
    %19 = vector.load %arg7[%c0_19, %c0_20, %c0_21] : memref<1x1x128xf32, #tpu.memory_space<vmem>>, vector<1x1x128xf32>
    tpu.vector_store %arg7[%c0_19, %c0_20, %c0_21], %18 {strides = array<i32>} : memref<1x1x128xf32, #tpu.memory_space<vmem>>, vector<1x1x128xf32>,
    return
  }
  func.func @transform_0(%arg0: i32, %arg1: i32, %arg2: i32) -> (i32, i32, i32) {
    %c1_i32 = arith.constant 1 : i32
    %0 = arith.muli %arg1, %c1_i32 : i32
    %1 = arith.addi %0, %arg2 : i32
    %c0_i32 = arith.constant 0 : i32
    %2 = arith.minsi %1, %c0_i32 : i32
    %c0_i32_0 = arith.constant 0 : i32
    %c0_i32_1 = arith.constant 0 : i32
    return %arg0, %2, %c0_i32_0 : i32, i32, i32
  }
  func.func @transform_1(%arg0: i32, %arg1: i32, %arg2: i32) -> (i32, i32, i32) {
    %c1_i32 = arith.constant 1 : i32
    %0 = arith.muli %arg1, %c1_i32 : i32
    %1 = arith.addi %0, %arg2 : i32
    %c0_i32 = arith.constant 0 : i32
    %2 = arith.minsi %1, %c0_i32 : i32
    %c0_i32_0 = arith.constant 0 : i32
    %c0_i32_1 = arith.constant 0 : i32
    return %arg0, %2, %c0_i32_0 : i32, i32, i32
  }
  func.func @transform_2(%arg0: i32, %arg1: i32, %arg2: i32) -> (i32, i32, i32) {
    %c1_i32 = arith.constant 1 : i32
    %0 = arith.muli %arg1, %c1_i32 : i32
    %1 = arith.addi %0, %arg2 : i32
    %c0_i32 = arith.constant 0 : i32
    %2 = arith.minsi %1, %c0_i32 : i32
    %c0_i32_0 = arith.constant 0 : i32
    %c0_i32_1 = arith.constant 0 : i32
    return %arg0, %2, %c0_i32_0 : i32, i32, i32
  }
  func.func @transform_3(%arg0: i32, %arg1: i32, %arg2: i32) -> (i32, i32, i32) {
    %c1_i32 = arith.constant 1 : i32
    %0 = arith.muli %arg0, %c1_i32 : i32
    %1 = arith.addi %0, %arg1 : i32
    %c0_i32 = arith.constant 0 : i32
    %c0_i32_0 = arith.constant 0 : i32
    %c0_i32_1 = arith.constant 0 : i32
    return %1, %c0_i32, %c0_i32_0 : i32, i32, i32
  }
  func.func @transform_4(%arg0: i32, %arg1: i32, %arg2: i32) -> (i32, i32, i32) {
    %c1_i32 = arith.constant 1 : i32
    %0 = arith.muli %arg0, %c1_i32 : i32
    %1 = arith.addi %0, %arg1 : i32
    %c0_i32 = arith.constant 0 : i32
    %c0_i32_0 = arith.constant 0 : i32
    %c0_i32_1 = arith.constant 0 : i32
    return %1, %c0_i32, %c0_i32_0 : i32, i32, i32
  }
}

</mosaic_0001>

<bundles_post_ra>
// kernel: tpu_custom_call.1
= control target key start
LH: loop header
LB: loop body
LE: loop exit
PB: predicated region body
PF: predicated region fallthrough
CT: control target
= control target key end

     0   :  { %s1213_s0 = inlined_call_operand.hbm [shape: f32[2,8,128], index: 0, kind: input, shape index: {}]   ;;  %s1214_s1 = inlined_call_operand.hbm [shape: f32[2,8,128], index: 1, kind: input, shape index: {}]   ;;  %s1215_s2 = inlined_call_operand.hbm [shape: bf16[2,8,128], index: 2, kind: input, shape index: {}]   ;;  %s1216_s3 = inlined_call_operand.hbm [shape: f32[2,1,128], index: 3, kind: output, shape index: {0}]   ;;  %s1217_s4 = inlined_call_operand.hbm [shape: f32[2,1,128], index: 4, kind: output, shape index: {1}]  }
   0x1   :  { %1227 = sst [smem:[#allocation19_spill]] %s1213_s0 }
   0x2   :  { %1228 = sst [smem:[#allocation20_spill]] %s1214_s1 }
   0x3   :  { %10 = vsyncpa [#allocation3], 0 }
   0x4   :  { %12 = vsyncpa [#allocation3 + $0x1], 0 }
   0x5   :  { %13 = vsyncpa [#allocation6], 0 }
   0x6   :  { %15 = vsyncpa [#allocation6 + $0x1], 0 }
   0x7   :  { %16 = vsyncpa [#allocation4], 0 }
   0x8   :  { %18 = vsyncpa [#allocation4 + $0x1], 0 }
   0x9   :  { %19 = vsyncpa [#allocation10], 0 }
   0xa   :  { %21 = vsyncpa [#allocation10 + $0x1], 0  ;;  %s916_s15 = smov 0   ;;  %s918_s16 = smov 0  }
   0xb   :  { %s920_s17 = smov 0   ;;  %s922_s18 = smov 0  }
   0xc   :  { %s924_s19 = smov 0   ;;  %s926_s20 = smov 0  }
   0xd LB: > { %1229 = sst [smem:[#allocation15_spill]] %s871_s17  ;;  %s947_s21 = sadd.s32 4294967295, %s883_s20   ;;  %s883_s20 = sphi %s926_s20, %s27_s20   ;;  %s879_s19 = sphi %s924_s19, %s1260_s19   ;;  %s875_s18 = sphi %s922_s18, %s1259_s18   ;;  %s871_s17 = sphi %s920_s17, %s1255_s17   ;;  %s867_s16 = sphi %s918_s16, %s1258_s16   ;;  %s863_s15 = sphi %s916_s15, %s1257_s15  }
   0xe   : > { %1230 = sst [smem:[#allocation16_spill]] %s883_s20  ;;  %s580_s22 = sadd.s32 4294967294, %s883_s20  }
   0xf   : > { %s46_s23 = sadd.s32 1, %s879_s19  ;;  %s61_s24 = sadd.s32 1, %s871_s17 }
  0x10   : > { %p48_p0 = scmp.ge.s32.totalorder %s46_s23, 2  ;;  %p68_p1 = scmp.ne.s32.totalorder %s871_s17, %s867_s16 }
  0x11   : > { %p69_p2 = scmp.eq.s32.totalorder %s883_s20, 0  ;;  %p74_p3 = scmp.ne.s32.totalorder %s867_s16, %s863_s15 }
  0x12   : > { %s1262_s23 = smov (%p48_p0, %s46_s23), 0  ;;  %p75_p5 = scmp.eq.s32.totalorder %s947_s21, 0 }
  0x13   : > { %1231 = sst [smem:[#allocation17_spill]] %s1262_s23  ;;  %p959_p4 = por %p69_p2, %p68_p1 }
  0x14   : > { %s56_s26 = ssub.s32 %s879_s19, %s1262_s23  ;;  %p168_p6 = scmp.eq.s32.totalorder %s947_s21, 1 }
  0x15   : > { %p59_p7 = scmp.eq.s32.totalorder %s56_s26, 0  ;;  %p967_p8 = por %p75_p5, %p74_p3 }
  0x16   : > { %p971_p9 = por %p168_p6, %p68_p1  ;;  %p174_p10 = scmp.eq.s32.totalorder %s580_s22, 1 }
  0x17   : > { %s1233_s27 = scalar_select %p967_p8, 1, 0 }
  0x18   : > { %s1234_s28 = scalar_select %p971_p9, 1, 0 }
  0x19   : > { %s976_s29 = scalar_select %p59_p7, %s871_s17, %s61_s24  }
  0x1a   : > { %p978_p11 = por %p174_p10, %p74_p3  ;;  %p624_p13 = scmp.lt.s32.totalorder %s883_s20, 2 }
  0x1b   : > { %1235 = sst [smem:[#allocation18_spill]] %s976_s29  ;;  %s985_s5 = sand.u32 1, %s871_s17  }
  0x1c   : > { %s1236_s30 = scalar_select %p978_p11, 1, 0 }
  0x1d   : > { %s1218_s6 = sshll.u32 %s985_s5, 3  ;;  %s584_s7 = sshll.u32 %s879_s19, 7 }
  0x1e   : > { %p991_p0 = pnand %p624_p13, %p959_p4  ;;  %s244_s9 = sand.u32 1, %s883_s20  }
  0x1f   : > { %s1238_s1 = sld [smem:[#allocation20_spill]]  ;;  %s248_s13 = scalar_lea.vmem [#allocation5], %s1218_s6 }
  0x20   : > { %s1237_s8 = scalar_select %p991_p0, 1, 0 }
  0x21   : > { %s259_s14 = sshll.u32 %s248_s13, 4  ;;  %s1009_s22 = scalar_lea.sflag [#allocation6], %s244_s9  ;;  %s1006_s14 = int_to_ptr.vmem [resolvable:$true] %s259_s14 }
  0x22   : > { %p1015_p4 = pneg %p991_p0 }
  0x25   : > { %s1001_s12 = scalar_lea.hbm %s1238_s1, %s584_s7  ;;  %s680_s11 = scalar_lea.hbm %s1238_s1, 256 }
  0x26   : > { %s675_s24 = scalar_lea.hbm %s1001_s12, 128  ;;  %p681_p7 = scmp.lt.u32.totalorder %s1001_s12, %s1238_s1 }
  0x27   : > { %p676_p3 = scmp.ne.s32.totalorder %s1001_s12, %s675_s24  ;;  %p682_p10 = scmp.lt.u32.totalorder %s680_s11, %s675_s24 }
  0x28   : > { %p684_p12 = scmp.lt.u32.totalorder %s675_s24, %s1001_s12 }
  0x29   : > { %p678_p5 = pnand %p1015_p4, %p676_p3  ;;  %p683_p13 = por %p682_p10, %p681_p7 }
  0x2b   : > { %p679_p6 = pneg %p678_p5  ;;  %p685_p1 = por %p684_p12, %p683_p13 }
  0x2d   : > { %p686_p2 = pnand %p685_p1, %p679_p6 }
  0x2f   : > { %689 = shalt.err (!%p686_p2)
}
  0x30   : > { %s690_s9 = scalar_lea.vmem %s1006_s14, 128  ;;  %s885_s26 = smov [#allocation5]  }
  0x31   : > { %p691_p3 = scmp.ne.s32.totalorder %s1006_s14, %s690_s9  ;;  %s695_s10 = sshll.u32 %s885_s26, 4  ;;  %s696_s10 = int_to_ptr.vmem [resolvable:$false] %s695_s10 }
  0x32   : > { %s697_s6 = scalar_lea.vmem %s696_s10, 256  ;;  %p698_p9 = scmp.lt.s32.totalorder %s1006_s14, %s696_s10 }
  0x33   : > { %p693_p5 = pnand %p691_p3, %p1015_p4  ;;  %p699_p8 = scmp.lt.s32.totalorder %s697_s6, %s690_s9 }
  0x35   : > { %p694_p11 = pneg %p693_p5  ;;  %p700_p7 = por %p699_p8, %p698_p9 }
  0x37   : > { %p701_p10 = pnand %p700_p7, %p694_p11 }
  0x39   : > { %704 = shalt.err (!%p701_p10)
}
  0x3a   : > { %613 = dma.hbm_to_vmem [thread:$0]  (!%p991_p0), %s1001_s12, 128, %s1006_s14, %s1009_s22  }
  0x3b   : > { %p1240_p12 = scmp.lt.s32.totalorder %s883_s20, 3  ;;  %p1241_p1 = scmp.ge.s32.totalorder %s883_s20, 1 }
  0x3c   : > { %s1243_s0 = sld [smem:[#allocation19_spill]]  ;;  %s1244_s26 = sshll.u32 %s985_s5, 3 }
  0x3d   : > { %p1043_p2 = pnand %p1241_p1, %p1240_p12  ;;  %s226_s10 = scalar_lea.vmem [#allocation2], %s1244_s26 }
  0x3e   : > { %s237_s6 = sshll.u32 %s226_s10, 4  ;;  %s223_s14 = scalar_lea.sflag [#allocation3], %s985_s5  ;;  %s238_s6 = int_to_ptr.vmem [resolvable:$true] %s237_s6 }
  0x3f   : > { %s1242_s24 = scalar_select %p1043_p2, 1, 0 }
  0x42   : > { %s1052_s9 = scalar_lea.hbm %s1243_s0, %s584_s7  ;;  %s710_s7 = scalar_lea.hbm %s1243_s0, 256 }
  0x43   : > { %s705_s1 = scalar_lea.hbm %s1052_s9, 128  ;;  %p711_p6 = scmp.lt.u32.totalorder %s1052_s9, %s1243_s0 }
  0x44   : > { %p706_p8 = scmp.ne.s32.totalorder %s1052_s9, %s705_s1  ;;  %p712_p13 = scmp.lt.u32.totalorder %s710_s7, %s705_s1 }
  0x45   : > { %p714_p5 = scmp.lt.u32.totalorder %s705_s1, %s1052_s9 }
  0x46   : > { %p708_p9 = pnand %p706_p8, %p1015_p4  ;;  %p713_p3 = por %p712_p13, %p711_p6 }
  0x48   : > { %p709_p11 = pneg %p708_p9  ;;  %p715_p7 = por %p714_p5, %p713_p3 }
  0x4a   : > { %p716_p10 = pnand %p715_p7, %p709_p11 }
  0x4c   : > { %719 = shalt.err (!%p716_p10)
}
  0x4d   : > { %s720_s26 = scalar_lea.vmem %s238_s6, 128  ;;  %s886_s10 = smov [#allocation2]  }
  0x4e   : > { %p721_p12 = scmp.ne.s32.totalorder %s238_s6, %s720_s26  ;;  %s725_s12 = sshll.u32 %s886_s10, 4  ;;  %s726_s12 = int_to_ptr.vmem [resolvable:$false] %s725_s12 }
  0x4f   : > { %s727_s23 = scalar_lea.vmem %s726_s12, 256  ;;  %p728_p9 = scmp.lt.s32.totalorder %s238_s6, %s726_s12 }
  0x50   : > { %p723_p1 = pnand %p721_p12, %p1015_p4  ;;  %p729_p2 = scmp.lt.s32.totalorder %s727_s23, %s720_s26 }
  0x52   : > { %p724_p8 = pneg %p723_p1  ;;  %p730_p0 = por %p729_p2, %p728_p9 }
  0x54   : > { %p731_p6 = pnand %p730_p0, %p724_p8 }
  0x56   : > { %734 = shalt.err (!%p731_p6)
}
  0x57   : > { %p1245_p13 = scmp.ne.s32.totalorder %s1237_s8, 0  ;;  %s588_s1 = sshll.u32 %s879_s19, 6 }
  0x58   : > { %s1246_s29 = sshll.u32 %s985_s5, 2  ;;  %s279_s0 = scalar_lea.hbm %s1215_s2, %s588_s1 }
  0x59   : > { %610 = dma.hbm_to_vmem [thread:$0]  (!%p1245_p13), %s1052_s9, 128, %s238_s6, %s223_s14  }
  0x5a   : > { %s270_s7 = scalar_lea.vmem [#allocation7], %s1246_s29  ;;  %s735_s12 = scalar_lea.hbm %s279_s0, 64 }
  0x5b   : > { %s281_s11 = sshll.u32 %s270_s7, 4  ;;  %p736_p2 = scmp.ne.s32.totalorder %s279_s0, %s735_s12  ;;  %s282_s11 = int_to_ptr.vmem [resolvable:$true] %s281_s11 }
  0x5c   : > { %s740_s17 = scalar_lea.hbm %s1215_s2, 128  ;;  %p741_p3 = scmp.lt.u32.totalorder %s279_s0, %s1215_s2 }
  0x5d   : > { %p738_p0 = pnand %p736_p2, %p1015_p4  ;;  %p742_p5 = scmp.lt.u32.totalorder %s740_s17, %s735_s12 }
  0x5e   : > { %p744_p10 = scmp.lt.u32.totalorder %s735_s12, %s279_s0 }
  0x5f   : > { %p739_p11 = pneg %p738_p0  ;;  %p743_p7 = por %p742_p5, %p741_p3 }
  0x61   : > { %p745_p12 = por %p744_p10, %p743_p7 }
  0x63   : > { %p746_p1 = pnand %p745_p12, %p739_p11 }
  0x65   : > { %749 = shalt.err (!%p746_p1)
}
  0x66   : > { %s750_s5 = scalar_lea.vmem %s282_s11, 64  ;;  %s887_s6 = smov [#allocation7]  }
  0x67   : > { %p751_p8 = scmp.ne.s32.totalorder %s282_s11, %s750_s5  ;;  %s755_s14 = sshll.u32 %s887_s6, 4  ;;  %s756_s14 = int_to_ptr.vmem [resolvable:$false] %s755_s14 }
  0x68   : > { %s757_s1 = scalar_lea.vmem %s756_s14, 128  ;;  %p758_p2 = scmp.lt.s32.totalorder %s282_s11, %s756_s14 }
  0x69   : > { %p753_p9 = pnand %p751_p8, %p1015_p4  ;;  %p759_p0 = scmp.lt.s32.totalorder %s757_s1, %s750_s5 }
  0x6b   : > { %p754_p6 = pneg %p753_p9  ;;  %p760_p13 = por %p759_p0, %p758_p2 }
  0x6d   : > { %p761_p3 = pnand %p760_p13, %p754_p6 }
  0x6f   : > { %764 = shalt.err (!%p761_p3)
}
  0x70   : > { %p1247_p5 = scmp.ne.s32.totalorder %s1237_s8, 0  ;;  %p1248_p11 = scmp.ne.s32.totalorder %s1242_s24, 0 }
  0x71   : > { %s1097_s17 = sand.u32 (!%p1248_p11), 1, %s867_s16   ;;  %p1249_p4 = scmp.ne.s32.totalorder (!%p1248_p11), %s1233_s27, 0 }
  0x72   : > { %616 = dma.hbm_to_vmem [thread:$0]  (!%p1247_p5), %s279_s0, 64, %s282_s11, %s1009_s22  }
  0x73   : > { %290 = sbr.rel (%p1248_p11) target bundleno = 183 (0xb7), region = 32  ;;  %s590_s20 = sshll.u32 (!%p1248_p11), %s1097_s17, 3 }
  0x74   : > { %s293_s25 = scalar_lea.sflag (!%p1248_p11), [#allocation3], %s1097_s17  ;;  %s296_s29 = scalar_lea.vmem (!%p1248_p11), [#allocation2], %s590_s20 }
  0x7a   : > { %846 = dma.done.wait (%p1249_p4), %s293_s25, 128  }
  0x7b   : > { %848 = vsyncadd (%p1249_p4), %s293_s25, 4294967168  ;;  %s301_s0 = sand.u32 1, %s947_s21   ;;  %s305_s22 = scalar_lea.vmem [#allocation5], %s590_s20 }
  0x7c   : > { %s302_s8 = scalar_lea.sflag [#allocation6], %s301_s0 }
  0x7d   : > { %850 = dma.done.wait (%p1249_p4), %s302_s8, 192  }
  0x7e   : > { %852 = vsyncadd (%p1249_p4), %s302_s8, 4294967104  ;;  %s1111_s24 = scalar_lea.vmem [#allocation8], %s1097_s17  ;;  %v888_v0 = vmov 0.0   ;;  %s1115_s7 = scalar_lea.vmem [#allocation9], %s1097_s17  ;;  %v369_v1 = vld [vmem:[%s296_s29] sm:$0xff]  ;;  %v370_v2 = vld [vmem:[%s305_s22] sm:$0xff] }
  0x7f   : > { %367 = vst [vmem:[%s1111_s24] sm:$0x1] %v888_v0  ;;  %368 = vst [vmem:[%s1115_s7] sm:$0x1] %v888_v0  ;;  %s592_s21 = sshll.u32 %s1097_s17, 2  ;;  %v373_v5 = vsub.f32 %v369_v1, %v370_v2  ;;  %s593_s27 = sshll.u32 %s875_s18, 4 }
  0x80   : > { %s314_s11 = scalar_lea.vmem [#allocation7], %s592_s21  ;;  %s426_s13 = sshll.u32 %s1115_s7, 4  ;;  %s1129_s13 = int_to_ptr.vmem [resolvable:$true] %s426_s13 }
  0x81   : > { %v371_v3 = vld [vmem:[%s314_s11] sm:$0xf]  ;;  %v374_v6 = vmul.f32 %v373_v5, %v373_v5  ;;  %s1127_s26 = scalar_lea.hbm %s1217_s4, %s593_s27  ;;  %s412_s23 = sshll.u32 %s1111_s24, 4  ;;  %s1165_s23 = int_to_ptr.vmem [resolvable:$true] %s412_s23 }
  0x82   : > { %v372_v4 = vunpack.c.l.bf16 %v371_v3  ;;  %s399_s9 = scalar_lea.sflag [#allocation10], %s1097_s17  ;;  %s765_s5 = scalar_lea.vmem %s1129_s13, 16 }
  0x83   : > { %p766_p13 = scmp.ne.s32.totalorder %s1129_s13, %s765_s5  ;;  %p1250_p7 = scmp.ne.s32.totalorder %s1234_s28, 0 }
  0x84   : > { %v386_v7 = vrot.slane %v372_v4, 4  ;;  %v375_v8 = vmul.f32 %v374_v6, %v372_v4  ;;  %s889_s6 = smov [#allocation9]  }
  0x85   : > { %p767_p10 = pnand %p766_p13, %p1250_p7  ;;  %s769_s14 = sshll.u32 %s889_s6, 4  ;;  %s770_s14 = int_to_ptr.vmem [resolvable:$false] %s769_s14 }
  0x86   : > { %v387_v9 = vadd.f32 %v386_v7, %v372_v4  ;;  %v377_v10 = vrot.slane %v375_v8, 4  ;;  %v385_v16 = vld [vmem:[%s1115_s7] sm:$0x1]  ;;  %s771_s1 = scalar_lea.vmem %s770_s14, 32  ;;  %p772_p1 = scmp.lt.s32.totalorder %s1129_s13, %s770_s14 }
  0x87   : > { %v376_v21 = vld [vmem:[%s1111_s24] sm:$0x1]  ;;  %p768_p12 = pneg %p767_p10  ;;  %p773_p8 = scmp.lt.s32.totalorder %s771_s1, %s765_s5 }
  0x88   : > { %v388_v11 = vrot.slane %v387_v9, 2  ;;  %v378_v12 = vadd.f32 %v377_v10, %v375_v8 }
  0x89   : > { %p774_p9 = por %p773_p8, %p772_p1 }
  0x8a   : > { %v389_v13 = vadd.f32 %v388_v11, %v387_v9  ;;  %v379_v14 = vrot.slane %v378_v12, 2 }
  0x8b   : > { %p775_p6 = pnand %p774_p9, %p768_p12 }
  0x8c   : > { %v390_v15 = vrot.slane %v389_v13, 1  ;;  %v380_v17 = vadd.f32 %v379_v14, %v378_v12 }
  0x8e   : > { %v391_v18 = vadd.f32 %v390_v15, %v389_v13  ;;  %v381_v19 = vrot.slane %v380_v17, 1 }
  0x90   : > { %v392_v20 = vadd.f32 %v391_v18, %v385_v16  ;;  %v382_v22 = vadd.f32 %v381_v19, %v380_v17 }
  0x92   : > { %393 = vst [vmem:[%s1115_s7] sm:$0x1] %v392_v20 }
  0x93   : > { %778 = shalt.err (!%p775_p6)
}
  0x94   : > { %s779_s20 = scalar_lea.hbm %s1127_s26, 16  ;;  %s783_s0 = scalar_lea.hbm %s1217_s4, 32 }
  0x95   : > { %p780_p2 = scmp.ne.s32.totalorder %s1127_s26, %s779_s20  ;;  %p784_p5 = scmp.lt.u32.totalorder %s1127_s26, %s1217_s4 }
  0x96   : > { %p785_p11 = scmp.lt.u32.totalorder %s783_s0, %s779_s20  ;;  %p787_p13 = scmp.lt.u32.totalorder %s779_s20, %s1127_s26 }
  0x97   : > { %p781_p0 = pnand %p780_p2, %p1250_p7 }
  0x98   : > { %p786_p4 = por %p785_p11, %p784_p5 }
  0x99   : > { %p782_p3 = pneg %p781_p0 }
  0x9a   : > { %p788_p10 = por %p787_p13, %p786_p4 }
  0x9c   : > { %p789_p12 = pnand %p788_p10, %p782_p3 }
  0x9e   : > { %792 = shalt.err (!%p789_p12)
}
  0x9f   : > { %604 = dma.vmem_to_hbm [thread:$0]  (%p1250_p7), %s1129_s13, 16, %s1127_s26, %s399_s9   ;;  %v383_v23 = vadd.f32 %v382_v22, %v376_v21 }
  0xa0   : > { %s1161_s11 = scalar_lea.hbm %s1216_s3, %s593_s27  ;;  %s395_s10 = scalar_lea.sflag [#allocation4], %s1097_s17 }
  0xa1   : > { %384 = vst [vmem:[%s1111_s24] sm:$0x1] %v383_v23  ;;  %s793_s12 = scalar_lea.vmem %s1165_s23, 16  ;;  %s890_s13 = smov [#allocation8]  }
  0xa2   : > { %p794_p1 = scmp.ne.s32.totalorder %s1165_s23, %s793_s12  ;;  %s797_s18 = sshll.u32 %s890_s13, 4  ;;  %s798_s18 = int_to_ptr.vmem [resolvable:$false] %s797_s18 }
  0xa3   : > { %s799_s26 = scalar_lea.vmem %s798_s18, 32  ;;  %p800_p6 = scmp.lt.s32.totalorder %s1165_s23, %s798_s18 }
  0xa4   : > { %p795_p8 = pnand %p794_p1, %p1250_p7  ;;  %p801_p2 = scmp.lt.s32.totalorder %s799_s26, %s793_s12 }
  0xa6   : > { %p796_p9 = pneg %p795_p8  ;;  %p802_p0 = por %p801_p2, %p800_p6 }
  0xa8   : > { %p803_p3 = pnand %p802_p0, %p796_p9 }
  0xaa   : > { %806 = shalt.err (!%p803_p3)
}
  0xab   : > { %s807_s17 = scalar_lea.hbm %s1161_s11, 16  ;;  %s811_s9 = scalar_lea.hbm %s1216_s3, 32 }
  0xac   : > { %p808_p5 = scmp.ne.s32.totalorder %s1161_s11, %s807_s17  ;;  %p812_p13 = scmp.lt.u32.totalorder %s1161_s11, %s1216_s3 }
  0xad   : > { %p813_p10 = scmp.lt.u32.totalorder %s811_s9, %s807_s17  ;;  %p815_p1 = scmp.lt.u32.totalorder %s807_s17, %s1161_s11 }
  0xae   : > { %p809_p11 = pnand %p808_p5, %p1250_p7 }
  0xaf   : > { %p814_p12 = por %p813_p10, %p812_p13 }
  0xb0   : > { %p810_p4 = pneg %p809_p11 }
  0xb1   : > { %p816_p8 = por %p815_p1, %p814_p12 }
  0xb3   : > { %p817_p9 = pnand %p816_p8, %p810_p4 }
  0xb5   : > { %820 = shalt.err (!%p817_p9)
}
  0xb6   : > { %603 = dma.vmem_to_hbm [thread:$0]  (%p1250_p7), %s1165_s23, 16, %s1161_s11, %s395_s10  }
  0xb7 PF: > { %s1251_s14 = sld [smem:[#allocation16_spill]]  ;;  %s438_s1 = sand.u32 1, %s863_s15  }
  0xb8   : > { %p1252_p6 = scmp.ne.s32.totalorder %s1236_s30, 0  ;;  %s439_s20 = scalar_lea.sflag [#allocation4], %s438_s1 }
  0xbd   : > { %p1253_p2 = scmp.ge.s32.totalorder %s1251_s14, 2 }
  0xbf   : > { %p618_p0 = pnand %p1253_p2, %p1252_p6 }
  0xc1   : > { %854 = dma.done.wait (!%p618_p0), %s439_s20, 16  }
  0xc2   : > { %856 = vsyncadd (!%p618_p0), %s439_s20, 4294967280  ;;  %s447_s25 = scalar_lea.sflag [#allocation10], %s438_s1 }
  0xc3   : > { %858 = dma.done.wait (!%p618_p0), %s447_s25, 16  }
  0xc4   : > { %860 = vsyncadd (!%p618_p0), %s447_s25, 4294967280  ;;  %s27_s20 = sadd.s32 1, %s1251_s14   ;;  %s1254_s28 = sld [smem:[#allocation15_spill]] }
  0xc5   : > { %p24_p3 = scmp.ge.s32.totalorder %s27_s20, 4   ;;  %s1255_s17 = sld [smem:[#allocation18_spill]] }
  0xc6   : > { %s1256_s23 = sld [smem:[#allocation17_spill]]  ;;  %s1257_s15 = smov %s867_s16 }
  0xc7   : > { %s1259_s18 = smov %s879_s19  ;;  %26 = sbr.rel (!%p24_p3) target bundleno = 13 (0xd), region = 122 }
  0xca   : > { %s1258_s16 = smov %s1254_s28 }
  0xcc   : > { %s1260_s19 = smov %s1256_s23 }
  0xce   :  { %451 = vsyncpa [#allocation3], 1 }
  0xcf   :  { %453 = vsyncpa [#allocation3 + $0x1], 1 }
  0xd0   :  { %454 = vsyncpa [#allocation6], 1 }
  0xd1   :  { %456 = vsyncpa [#allocation6 + $0x1], 1 }
  0xd2   :  { %457 = vsyncpa [#allocation4], 1 }
  0xd3   :  { %459 = vsyncpa [#allocation4 + $0x1], 1 }
  0xd4   :  { %460 = vsyncpa [#allocation10], 1 }
  0xd5   :  { %462 = vsyncpa [#allocation10 + $0x1], 1 }

</bundles_post_ra>
